<compile_context>
chip_gen: v7x
topology: tpu7x:2x2x1
jax: 0.10.0
libtpu: 0.0.40
codegen_flags: <defaults>
</compile_context>

<pallas_src>
import functools

import jax
import jax.numpy as jnp
from jax import lax
from jax.experimental import pallas as pl
from jax.experimental.pallas import tpu as pltpu

_LANES = 128


def _slab_sum_f32(x_ref, b0, bs):
    """Exact-f32 sum over the spatial (lane) axis for batches [b0, b0+bs).

    Returns (bs, C, 1) float32.  Bulk adds run on the VPU across 128-lane
    chunks; only the final 128-wide reduce touches the XLU.  `bs` is chosen by
    the caller so the live f32 accumulator fits in the vector register file.
    """
    HW = x_ref.shape[-1]
    bsl = slice(b0, b0 + bs)

    if HW % _LANES != 0:
        # TODO(synk): for maps with H*W % 128 != 0 (e.g. 7x7 late-stage SE) a
        # channels-last layout would keep stores lane-dense; this fallback is
        # correct (masked partial stores) and the upcast is bounded by `bs`.
        return jnp.sum(x_ref[bsl], axis=-1, keepdims=True, dtype=jnp.float32)

    nch = HW // _LANES
    acc = x_ref[bsl, :, 0:_LANES].astype(jnp.float32)
    if nch > 1:
        if nch <= 8:
            # Short maps: static unroll with constant, aligned lane offsets.
            for k in range(1, nch):
                acc = acc + x_ref[bsl, :, k * _LANES:(k + 1) * _LANES].astype(jnp.float32)
        else:
            # Long maps: bounded-code fori_loop over aligned lane chunks.
            def body(k, a):
                off = pl.multiple_of(k * _LANES, _LANES)
                return a + x_ref[bsl, :, pl.ds(off, _LANES)].astype(jnp.float32)
            acc = lax.fori_loop(1, nch, body, acc, unroll=4)
    return jnp.sum(acc, axis=-1, keepdims=True)


def se_kernel(x_ref, w1_ref, w2t_ref, o_ref, *, inv_hw):
    """One grid step over a (bpb, C, HW) slab of batches.

    x_ref  : (bpb, C, HW)   input slab, native dtype
    w1_ref : (Cmid, C)      squeeze 1x1-conv weight (natural Conv2d layout)
    w2t_ref: (Cmid, C)      excite 1x1-conv weight, pre-transposed
    o_ref  : (bpb, C, HW)   gated output
    """
    bpb, C, HW = x_ref.shape

    # ---- global average pool (exact f32) ------------------------------------
    # Sub-batch so the (bs, C, 128) f32 accumulator stays within ~32 vregs and
    # never spills to VMEM, while bounding the number of unrolled sub-slabs.
    bs = max(1, min(bpb, max(256 // max(C, 1), -(-bpb // 16))))
    parts = []
    for b0 in range(0, bpb, bs):
        parts.append(_slab_sum_f32(x_ref, b0, min(bs, bpb - b0)))
    sums = parts[0] if len(parts) == 1 else jnp.concatenate(parts, axis=0)  # (bpb, C, 1)

    # Move channels onto the lane axis: the whole gate path below then works on
    # dense C-wide tiles instead of width-1 / width-Cmid vregs.
    ctx = jnp.transpose(sums, (0, 2, 1)) * inv_hw                 # (bpb, 1, C) f32

    # ---- squeeze / excite MLP (lane-dense, exact f32 on the VPU) -------------
    # Only ~C*Cmid MACs per batch; VPU broadcast-mul + small reductions keep
    # the math exact f32 and off the serial MXU matvec path.
    w1 = w1_ref[...].astype(jnp.float32)                          # (Cmid, C)
    w2t = w2t_ref[...].astype(jnp.float32)                        # (Cmid, C)

    h = jnp.sum(ctx * w1[None, :, :], axis=-1, keepdims=True)     # (bpb, Cmid, 1)
    h = jnp.maximum(h, 0.0)                                       # ReLU
    g = jnp.sum(h * w2t[None, :, :], axis=1, keepdims=True)       # (bpb, 1, C)
    g = jax.nn.sigmoid(g)                                         # lane-dense sigmoid

    # ---- apply gate: multiply in the native dtype, cast only the gate --------
    # (For bf16 inputs this matches the module up to ~2^-8 relative; exact for f32.)
    gate = jnp.transpose(g, (0, 2, 1)).astype(o_ref.dtype)        # (bpb, C, 1)
    o_ref[...] = x_ref[...] * gate


def _vmem_capacity_bytes():
    """Physical VMEM per TensorCore; conservative v7x fallback if unknown."""
    try:
        cap = getattr(pltpu.get_tpu_info(), "vmem_capacity_bytes", None)
        if cap:
            return int(cap)
    except Exception:
        pass
    return 64 << 20


def squeeze_and_excitation(x, w1, w2, *, batch_block_bytes=None):
    """x: (B, C, H, W); w1: (Cmid, C) squeeze weight; w2: (C, Cmid) excite weight."""
    B, C, H, W = x.shape
    HW = H * W
    Cmid = w1.shape[0]

    # (B, C, H, W) -> (B, C, H*W): free, contiguous reshape; spatial axis last
    # (lane axis) so loads/stores are lane-dense whenever H*W % 128 == 0.
    x3 = x.reshape(B, C, HW)

    # ---- per-chip block / VMEM budget ----------------------------------------
    vmem_cap = _vmem_capacity_bytes()
    if batch_block_bytes is None:
        # v5e/v6e: 128 MiB VMEM -> larger blocks push the HBM stream to roofline.
        # v7x: 64 MiB VMEM per TC -> moderate blocks keep the 2x double-buffered
        # I/O plus temporaries comfortably resident.
        batch_block_bytes = (14 << 20) if vmem_cap >= (96 << 20) else (5 << 20)

    per_batch = int(C * HW * x.dtype.itemsize)
    bpb = int(max(1, min(B, batch_block_bytes // max(per_batch, 1))))
    # Keep the grid at >= min(B, 4) steps: restores prefetch/writeback overlap
    # and lets both v7x TensorCores take work on the "parallel" batch axis.
    min_grid = min(B, 4)
    bpb = min(bpb, max(1, -(-B // max(min_grid, 1))))
    # Bound in-kernel sub-batch unrolling / accumulator footprint.
    bpb = min(bpb, 64)
    grid = (pl.cdiv(B, bpb),)   # ragged last block: reads padded, writes masked

    blk_bytes = bpb * per_batch
    w_bytes = 4 * int(w1.size + w2.size)
    # Double-buffered input + output blocks + weights + f32 pooling/MLP temps.
    resident = 4 * blk_bytes + 4 * w_bytes + (3 << 20)
    max_limit = min(int(0.75 * vmem_cap), 100 << 20)
    vmem_limit = int(min(max(resident, 32 << 20), max_limit))

    cost = pl.CostEstimate(
        flops=int(2 * B * C * HW + 4 * B * C * Cmid),
        transcendentals=int(B * C),
        bytes_accessed=int(2 * B * C * HW * x.dtype.itemsize),
    )

    kernel = functools.partial(se_kernel, inv_hw=1.0 / HW)

    out = pl.pallas_call(
        kernel,
        out_shape=jax.ShapeDtypeStruct((B, C, HW), x.dtype),
        grid=grid,
        in_specs=[
            pl.BlockSpec((bpb, C, HW), lambda i: (i, 0, 0)),
            pl.BlockSpec((Cmid, C), lambda i: (0, 0)),
            pl.BlockSpec((Cmid, C), lambda i: (0, 0)),
        ],
        out_specs=pl.BlockSpec((bpb, C, HW), lambda i: (i, 0, 0)),
        compiler_params=pltpu.CompilerParams(
            dimension_semantics=("parallel",),
            vmem_limit_bytes=vmem_limit,
        ),
        cost_estimate=cost,
    )(x3, w1, jnp.transpose(w2))
    return out.reshape(B, C, H, W)


def se_reference(x, w1, w2):
    # Pure-JAX reference mirroring the PyTorch forward (pooling_type='avg').
    ctx = jnp.mean(x, axis=(2, 3), keepdims=True)                 # (B, C, 1, 1)
    h = jnp.einsum('mc,bcij->bmij', w1, ctx, precision=lax.Precision.HIGHEST)
    h = jnp.maximum(h, 0.0)
    g = jnp.einsum('cm,bmij->bcij', w2, h, precision=lax.Precision.HIGHEST)
    g = jax.nn.sigmoid(g)
    return g * x


if __name__ == "__main__":
    # Module config: in_channels=64, reduction=16 -> mid channels = 4.
    B, C, H, W = 2, 64, 16, 16
    reduction = 16
    Cmid = C // reduction

    key = jax.random.PRNGKey(0)
    kx, k1, k2 = jax.random.split(key, 3)

    x = jax.random.normal(kx, (B, C, H, W), dtype=jnp.float32)
    # Conv2d(C, Cmid, 1, bias=False).weight: (Cmid, C, 1, 1) -> (Cmid, C)
    w1 = jax.random.normal(k1, (Cmid, C), dtype=jnp.float32) * (2.0 / C) ** 0.5
    # Conv2d(Cmid, C, 1, bias=False).weight: (C, Cmid, 1, 1) -> (C, Cmid)
    w2 = jax.random.normal(k2, (C, Cmid), dtype=jnp.float32) * (2.0 / Cmid) ** 0.5

    out = jax.block_until_ready(squeeze_and_excitation(x, w1, w2))
    ref = se_reference(x, w1, w2)

    assert out.shape == (B, C, H, W)
    assert jnp.allclose(out, ref, atol=1e-5, rtol=1e-5), "mismatch vs reference"

    # TODO(synk): pooling_type='attn' branch (conv_mask + softmax context) is
    # not implemented; the default constructor path ('avg') is reproduced here.
    print("KERNEL_OK")
</pallas_src>

<mosaic_0001>
module attributes {stable_mosaic.version = 11 : i64} {
  func.func @se_kernel(%arg0: i32, %arg1: memref<1x64x256xf32, #tpu.memory_space<vmem>>, %arg2: memref<4x64xf32, #tpu.memory_space<vmem>>, %arg3: memref<4x64xf32, #tpu.memory_space<vmem>>, %arg4: memref<1x64x256xf32, #tpu.memory_space<vmem>>) attributes {dimension_semantics = [#tpu.dimension_semantics<parallel>], iteration_bounds = array<i64: 2>, scalar_prefetch = 0 : i64, scratch_operands = 0 : i64, tpu.core_type = #tpu.core_type<tc>, window_params = [{transform_indices = @transform_0, window_bounds = array<i64: 1, 64, 256>}, {pipeline_mode = #tpu.pipeline_mode<synchronous>, transform_indices = @transform_1, window_bounds = array<i64: 4, 64>}, {pipeline_mode = #tpu.pipeline_mode<synchronous>, transform_indices = @transform_2, window_bounds = array<i64: 4, 64>}, {transform_indices = @transform_3, window_bounds = array<i64: 1, 64, 256>}]} {
    %c0 = arith.constant 0 : index
    %c0_0 = arith.constant 0 : index
    %c0_1 = arith.constant 0 : index
    %0 = vector.load %arg1[%c0, %c0_0, %c0_1] : memref<1x64x256xf32, #tpu.memory_space<vmem>>, vector<1x64x128xf32>
    %c0_2 = arith.constant 0 : index
    %c0_3 = arith.constant 0 : index
    %c128 = arith.constant 128 : index
    %1 = vector.load %arg1[%c0_2, %c0_3, %c128] : memref<1x64x256xf32, #tpu.memory_space<vmem>>, vector<1x64x128xf32>
    %2 = arith.addf %0, %1 : vector<1x64x128xf32>
    %cst = arith.constant dense<0.000000e+00> : vector<1x64xf32>
    %3 = vector.multi_reduction <add>, %2, %cst [2] : vector<1x64x128xf32> to vector<1x64xf32>
    %4 = vector.shape_cast %3 : vector<1x64xf32> to vector<1x64x1xf32>
    %5 = tpu.transpose %4, [0, 2, 1] : vector<1x64x1xf32> -> vector<1x1x64xf32>
    %cst_4 = arith.constant 3.906250e-03 : f32
    %6 = vector.broadcast %cst_4 : f32 to vector<1x1x64xf32>
    %7 = arith.mulf %5, %6 : vector<1x1x64xf32>
    %c0_5 = arith.constant 0 : index
    %c0_6 = arith.constant 0 : index
    %8 = vector.load %arg2[%c0_5, %c0_6] : memref<4x64xf32, #tpu.memory_space<vmem>>, vector<4x64xf32>
    %c0_7 = arith.constant 0 : index
    %c0_8 = arith.constant 0 : index
    %9 = vector.load %arg3[%c0_7, %c0_8] : memref<4x64xf32, #tpu.memory_space<vmem>>, vector<4x64xf32>
    %10 = vector.shape_cast %8 : vector<4x64xf32> to vector<1x4x64xf32>
    %11 = vector.broadcast %7 : vector<1x1x64xf32> to vector<1x4x64xf32>
    %12 = arith.mulf %11, %10 : vector<1x4x64xf32>
    %cst_9 = arith.constant dense<0.000000e+00> : vector<1x4xf32>
    %13 = vector.multi_reduction <add>, %12, %cst_9 [2] : vector<1x4x64xf32> to vector<1x4xf32>
    %14 = vector.shape_cast %13 : vector<1x4xf32> to vector<1x4x1xf32>
    %cst_10 = arith.constant 0.000000e+00 : f32
    %15 = vector.broadcast %cst_10 : f32 to vector<1x4x1xf32>
    %16 = arith.maximumf %14, %15 : vector<1x4x1xf32>
    %17 = vector.shape_cast %9 : vector<4x64xf32> to vector<1x4x64xf32>
    %18 = vector.broadcast %16 : vector<1x4x1xf32> to vector<1x4x64xf32>
    %19 = arith.mulf %18, %17 : vector<1x4x64xf32>
    %cst_11 = arith.constant dense<0.000000e+00> : vector<1x64xf32>
    %20 = vector.multi_reduction <add>, %19, %cst_11 [1] : vector<1x4x64xf32> to vector<1x64xf32>
    %21 = vector.shape_cast %20 : vector<1x64xf32> to vector<1x1x64xf32>
    %22 = arith.negf %21 : vector<1x1x64xf32>
    %23 = math.exp %22 : vector<1x1x64xf32>
    %cst_12 = arith.constant 1.000000e+00 : f32
    %24 = vector.broadcast %cst_12 : f32 to vector<1x1x64xf32>
    %25 = arith.addf %24, %23 : vector<1x1x64xf32>
    %26 = arith.divf %24, %25 : vector<1x1x64xf32>
    %27 = tpu.transpose %26, [0, 2, 1] : vector<1x1x64xf32> -> vector<1x64x1xf32>
    %c0_13 = arith.constant 0 : index
    %c0_14 = arith.constant 0 : index
    %c0_15 = arith.constant 0 : index
    %28 = vector.load %arg1[%c0_13, %c0_14, %c0_15] : memref<1x64x256xf32, #tpu.memory_space<vmem>>, vector<1x64x256xf32>
    %29 = vector.broadcast %27 : vector<1x64x1xf32> to vector<1x64x256xf32>
    %30 = arith.mulf %28, %29 : vector<1x64x256xf32>
    %c0_16 = arith.constant 0 : index
    %c0_17 = arith.constant 0 : index
    %c0_18 = arith.constant 0 : index
    %31 = vector.load %arg4[%c0_16, %c0_17, %c0_18] : memref<1x64x256xf32, #tpu.memory_space<vmem>>, vector<1x64x256xf32>
    tpu.vector_store %arg4[%c0_16, %c0_17, %c0_18], %30 {strides = array<i32>} : memref<1x64x256xf32, #tpu.memory_space<vmem>>, vector<1x64x256xf32>,
    return
  }
  func.func @transform_0(%arg0: i32) -> (i32, i32, i32) {
    %c0_i32 = arith.constant 0 : i32
    %c0_i32_0 = arith.constant 0 : i32
    %c0_i32_1 = arith.constant 0 : i32
    return %arg0, %c0_i32, %c0_i32_0 : i32, i32, i32
  }
  func.func @transform_1(%arg0: i32) -> (i32, i32) {
    %c0_i32 = arith.constant 0 : i32
    %c0_i32_0 = arith.constant 0 : i32
    %c0_i32_1 = arith.constant 0 : i32
    return %c0_i32, %c0_i32_0 : i32, i32
  }
  func.func @transform_2(%arg0: i32) -> (i32, i32) {
    %c0_i32 = arith.constant 0 : i32
    %c0_i32_0 = arith.constant 0 : i32
    %c0_i32_1 = arith.constant 0 : i32
    return %c0_i32, %c0_i32_0 : i32, i32
  }
  func.func @transform_3(%arg0: i32) -> (i32, i32, i32) {
    %c0_i32 = arith.constant 0 : i32
    %c0_i32_0 = arith.constant 0 : i32
    %c0_i32_1 = arith.constant 0 : i32
    return %arg0, %c0_i32, %c0_i32_0 : i32, i32, i32
  }
}

</mosaic_0001>

<bundles_post_ra>
// kernel: tpu_custom_call.1
= control target key start
LH: loop header
LB: loop body
LE: loop exit
PB: predicated region body
PF: predicated region fallthrough
CT: control target
= control target key end

     0   :  { %8 = vsyncpa [#allocation3], 0  ;;  %s1044_s0 = inlined_call_operand.hbm [shape: f32[2,64,256], index: 0, kind: input, shape index: {}]   ;;  %s1045_s1 = inlined_call_operand.hbm [shape: f32[4,64], index: 1, kind: input, shape index: {}]   ;;  %s1046_s2 = inlined_call_operand.vmem [shape: f32[4,64], index: 2, kind: input, shape index: {}]   ;;  %s1047_s3 = inlined_call_operand.hbm [shape: f32[2,64,256], index: 3, kind: output, shape index: {}]  }
   0x1   :  { %10 = vsyncpa [#allocation3 + $0x1], 0 }
   0x2   :  { %11 = vsyncpa [#allocation6], 0 }
   0x3   :  { %12 = vsyncpa [#allocation4], 0 }
   0x4   :  { %14 = vsyncpa [#allocation4 + $0x1], 0  ;;  %s756_s12 = smov 0   ;;  %s758_s13 = smov 0  }
   0x5   :  { %s760_s14 = smov 0   ;;  %s762_s15 = smov 0  }
   0x6 LB: > { %s777_s16 = sadd.s32 4294967295, %s726_s15   ;;  %s510_s17 = sadd.s32 4294967294, %s726_s15   ;;  %s726_s15 = sphi %s762_s15, %s1072_s15   ;;  %s722_s14 = sphi %s760_s14, %s1071_s14   ;;  %s718_s13 = sphi %s758_s13, %s1070_s13   ;;  %s714_s12 = sphi %s756_s12, %s1069_s12  }
   0x7   : > { %s781_s18 = sadd.s32 1, %s726_s15   ;;  %s27_s19 = sadd.s32 1, %s722_s14 }
   0x8   : > { %s24_s20 = ssub.s32 %s726_s15, %s781_s18  ;;  %p34_p0 = scmp.ne.s32.totalorder %s722_s14, %s718_s13 }
   0x9   : > { %p25_p1 = scmp.eq.s32.totalorder %s24_s20, 0  ;;  %p35_p2 = scmp.eq.s32.totalorder %s726_s15, 0 }
   0xa   : > { %p40_p3 = scmp.ne.s32.totalorder %s718_s13, %s714_s12  ;;  %p1048_p4 = scmp.eq.s32.totalorder %s777_s16, 0 }
   0xb   : > { %s793_s21 = scalar_select %p25_p1, %s722_s14, %s27_s19  }
   0xc   : > { %p795_p5 = por %p35_p2, %p34_p0  ;;  %p801_p6 = por %p1048_p4, %p40_p3 }
   0xd   : > { %p106_p7 = scmp.eq.s32.totalorder %s777_s16, 1  ;;  %p112_p8 = scmp.eq.s32.totalorder %s510_s17, 1 }
   0xe   : > { %s1054_s23 = scalar_select %p801_p6, 1, 0 }
   0xf   : > { %p511_p9 = scmp.ge.s32.totalorder %s726_s15, 1  ;;  %p119_p10 = scmp.lt.s32.totalorder %s726_s15, 3 }
  0x10   : > { %p808_p11 = por %p106_p7, %p34_p0  ;;  %p812_p12 = por %p112_p8, %p40_p3 }
  0x11   : > { %p816_p13 = pnand %p511_p9, %p119_p10  ;;  %s728_s27 = smov [#allocation5]  }
  0x12   : > { %s1055_s24 = scalar_select %p808_p11, 1, 0 }
  0x13   : > { %s1056_s25 = scalar_select %p812_p12, 1, 0 }
  0x14   : > { %s1057_s26 = scalar_select %p816_p13, 1, 0 }
  0x15   : > { %p537_p2 = pneg %p816_p13  ;;  %s132_s28 = sshll.u32 %s728_s27, 4  ;;  %s133_s28 = int_to_ptr.vmem [resolvable:$true] %s132_s28 }
  0x16   : > { %p550_p4 = scmp.lt.s32.totalorder %s726_s15, 2  ;;  %p1058_p0 = scmp.eq.s32.totalorder %s777_s16, 0 }
  0x17   : > { %s146_s30 = sand.u32 1, %s722_s14   ;;  %s598_s8 = scalar_lea.hbm %s1045_s1, 64 }
  0x18   : > { %p826_p7 = pnand %p537_p2, %p1058_p0  ;;  %p833_p3 = pnand %p550_p4, %p795_p5 }
  0x19   : > { %s514_s5 = sshll.u32 %s146_s30, 7  ;;  %p599_p8 = scmp.ne.s32.totalorder %s1045_s1, %s598_s8 }
  0x1a   : > { %s1060_s4 = scalar_select %p833_p3, 1, 0 }
  0x1b   : > { %p600_p9 = pneg %p826_p7  ;;  %p605_p4 = scmp.lt.u32.totalorder %s598_s8, %s1045_s1 }
  0x1d   : > { %p601_p10 = pnand %p600_p9, %p599_p8 }
  0x1f   : > { %p602_p2 = pneg %p601_p10 }
  0x21   : > { %p607_p5 = pnand %p605_p4, %p602_p2 }
  0x23   : > { %610 = shalt.err (!%p607_p5)
}
  0x24   : > { %s611_s19 = scalar_lea.vmem %s133_s28, 64  ;;  %p619_p11 = scmp.lt.s32.totalorder %s133_s28, %s133_s28 }
  0x25   : > { %p612_p0 = scmp.ne.s32.totalorder %s133_s28, %s611_s19  ;;  %p620_p6 = scmp.lt.s32.totalorder %s611_s19, %s611_s19 }
  0x27   : > { %p614_p1 = pnand %p612_p0, %p600_p9  ;;  %p621_p13 = por %p620_p6, %p619_p11 }
  0x29   : > { %p615_p12 = pneg %p614_p1 }
  0x2b   : > { %p622_p3 = pnand %p621_p13, %p615_p12 }
  0x2d   : > { %625 = shalt.err (!%p622_p3)
}
  0x2e   : > { %540 = dma.hbm_to_vmem [thread:$0]  (!%p826_p7), %s1045_s1, 64, %s133_s28, [#allocation6]  }
  0x2f   : > { %s527_s27 = sshll.u32 %s726_s15, 11  ;;  %s150_s6 = scalar_lea.vmem [#allocation2], %s514_s5 }
  0x30   : > { %s157_s7 = sshll.u32 %s150_s6, 4  ;;  %s857_s10 = scalar_lea.hbm %s1044_s0, %s527_s27  ;;  %s859_s7 = int_to_ptr.vmem [resolvable:$true] %s157_s7 }
  0x31   : > { %s861_s29 = scalar_lea.sflag [#allocation3], %s146_s30  ;;  %s626_s11 = scalar_lea.hbm %s857_s10, 2048 }
  0x32   : > { %p627_p6 = scmp.ne.s32.totalorder %s857_s10, %s626_s11  ;;  %p1061_p11 = scmp.ne.s32.totalorder %s1060_s4, 0 }
  0x33   : > { %s631_s17 = scalar_lea.hbm %s1044_s0, 4096  ;;  %p632_p7 = scmp.lt.u32.totalorder %s857_s10, %s1044_s0 }
  0x34   : > { %p628_p12 = pneg %p1061_p11  ;;  %p633_p3 = scmp.lt.u32.totalorder %s631_s17, %s626_s11 }
  0x35   : > { %p635_p9 = scmp.lt.u32.totalorder %s626_s11, %s857_s10 }
  0x36   : > { %p629_p13 = pnand %p628_p12, %p627_p6  ;;  %p634_p8 = por %p633_p3, %p632_p7 }
  0x38   : > { %p630_p1 = pneg %p629_p13  ;;  %p636_p10 = por %p635_p9, %p634_p8 }
  0x3a   : > { %p637_p2 = pnand %p636_p10, %p630_p1 }
  0x3c   : > { %640 = shalt.err (!%p637_p2)
}
  0x3d   : > { %s641_s30 = scalar_lea.vmem %s859_s7, 2048  ;;  %s729_s22 = smov [#allocation2]  }
  0x3e   : > { %p642_p4 = scmp.ne.s32.totalorder %s859_s7, %s641_s30  ;;  %s646_s27 = sshll.u32 %s729_s22, 4  ;;  %s647_s27 = int_to_ptr.vmem [resolvable:$false] %s646_s27 }
  0x3f   : > { %s648_s6 = scalar_lea.vmem %s647_s27, 4096  ;;  %p649_p6 = scmp.lt.s32.totalorder %s859_s7, %s647_s27 }
  0x40   : > { %p644_p5 = pnand %p642_p4, %p628_p12  ;;  %p650_p13 = scmp.lt.s32.totalorder %s648_s6, %s641_s30 }
  0x42   : > { %p645_p0 = pneg %p644_p5  ;;  %p651_p7 = por %p650_p13, %p649_p6 }
  0x44   : > { %p652_p3 = pnand %p651_p7, %p645_p0 }
  0x46   : > { %655 = shalt.err (!%p652_p3)
}
  0x47   : > { %s730_s8 = smov 256   ;;  %s731_s9 = smov 16  }
  0x48   : > { %544 = dma.hbm_to_vmem [thread:$0]  (!%p1061_p11), %s857_s10, 2048, %s859_s7, %s861_s29, %s730_s8, %s730_s8, %s731_s9  }
  0x49   : > { %p1062_p12 = scmp.ne.s32.totalorder %s1057_s26, 0 }
  0x4a   : > { %s892_s11 = sand.u32 (!%p1062_p12), 1, %s718_s13   ;;  %p1063_p1 = scmp.ne.s32.totalorder (!%p1062_p12), %s1054_s23, 0 }
  0x4b   : > { %169 = sbr.rel (%p1062_p12) target bundleno = 854 (0x356), region = 32  ;;  %s518_s28 = sshll.u32 (!%p1062_p12), %s892_s11, 7 }
  0x4c   : > { %s172_s5 = scalar_lea.sflag (!%p1062_p12), [#allocation3], %s892_s11  ;;  %s175_s17 = scalar_lea.vmem (!%p1062_p12), [#allocation2], %s518_s28 }
  0x52   : > { %701 = dma.done.wait (%p1063_p1), %s172_s5, 2048  }
  0x53   : > { %703 = vsyncadd (%p1063_p1), %s172_s5, 4294965248  ;;  %p1064_p11 = scmp.eq.s32.totalorder %s777_s16, 0 }
  0x55   : > { %705 = dma.done.wait (%p1064_p11), [#allocation6], 64   ;;  %p1065_p8 = pmov %p1064_p11 }
  0x56   : > { %v906_v0 = vld [vmem:[%s175_s17] sm:$0xff]  ;;  %v908_v1 = vld [vmem:[%s175_s17 + $0x8] sm:$0xff]  ;;  %v910_v2 = vld [vmem:[%s175_s17 + $0x10] sm:$0xff]  ;;  %v277_v32 = vlaneseq  ;;  %vm282_vm0 = vcmask 519168   ;;  %v732_v41 = vmov 0   ;;  %s961_s4 = scalar_lea.vmem [#allocation7], %s518_s28 }
  0x57   : > { %707 = vsyncadd (%p1065_p8), [#allocation6], 4294967232  ;;  %v218_v3 = vadd.f32 %v908_v1, %v906_v0  ;;  %v914_v4 = vld [vmem:[%s175_s17 + $0x18] sm:$0xff]  ;;  %v916_v5 = vld [vmem:[%s175_s17 + $0x20] sm:$0xff]  ;;  %s528_s7 = sshll.u32 %s777_s16, 11  ;;  %s427_s10 = sshll.u32 %s961_s4, 4  ;;  %s996_s10 = int_to_ptr.vmem [resolvable:$true] %s427_s10 }
  0x58   : > { %v918_v6 = vld [vmem:[%s175_s17 + $0x28] sm:$0xff]  ;;  %v922_v8 = vld [vmem:[%s175_s17 + $0x30] sm:$0xff]  ;;  %v924_v9 = vld [vmem:[%s175_s17 + $0x38] sm:$0xff]  ;;  %v219_v10 = vadd.f32 %v914_v4, %v910_v2  ;;  %v278_v33 = vshrl.u32 %v277_v32, 7  ;;  %s994_s20 = scalar_lea.hbm %s1047_s3, %s528_s7  ;;  %s414_s16 = scalar_lea.sflag [#allocation4], %s892_s11 }
  0x59   : > { %v220_v7 = vadd.f32 %v918_v6, %v916_v5  ;;  %226 = vadd.xlane.f32.xlu0 %v218_v3  ;;  %v221_v11 = vadd.f32 %v924_v9, %v922_v8  ;;  %v930_v12 = vld [vmem:[%s175_s17 + $0x40] sm:$0xff]  ;;  %v932_v13 = vld [vmem:[%s175_s17 + $0x48] sm:$0xff]  ;;  %v934_v14 = vld [vmem:[%s175_s17 + $0x50] sm:$0xff]  ;;  %s656_s30 = scalar_lea.vmem %s996_s10, 2048  ;;  %p1066_p10 = scmp.ne.s32.totalorder %s1055_s24, 0 }
  0x5a   : > { %v936_v15 = vld [vmem:[%s175_s17 + $0x58] sm:$0xff]  ;;  %v222_v16 = vadd.f32 %v932_v13, %v930_v12  ;;  %v942_v18 = vld [vmem:[%s175_s17 + $0x60] sm:$0xff]  ;;  %v944_v19 = vld [vmem:[%s175_s17 + $0x68] sm:$0xff]  ;;  %v279_v34 = vsub.s32 0, %v278_v33  ;;  %p657_p9 = scmp.ne.s32.totalorder %s996_s10, %s656_s30  ;;  %s733_s22 = smov [#allocation7]  }
  0x5b   : > { %230 = vadd.xlane.f32.xlu1 %v220_v7  ;;  %v223_v17 = vadd.f32 %v936_v15, %v934_v14  ;;  %v946_v20 = vld [vmem:[%s175_s17 + $0x70] sm:$0xff]  ;;  %v948_v21 = vld [vmem:[%s175_s17 + $0x78] sm:$0xff]  ;;  %v224_v22 = vadd.f32 %v944_v19, %v942_v18  ;;  %v275_v37 = vld [vmem:[#allocation5] sm:$0xf]  ;;  %s660_s27 = sshll.u32 %s733_s22, 4  ;;  %s661_s27 = int_to_ptr.vmem [resolvable:$false] %s660_s27 }
  0x5c   : > { %v225_v23 = vadd.f32 %v948_v21, %v946_v20  ;;  %v276_v42 = vld [vmem:[%s1046_s2] sm:$0xf]  ;;  %p658_p2 = pnand %p657_p9, %p1066_p10  ;;  %s662_s6 = scalar_lea.vmem %s661_s27, 4096 }
  0x5d   : > { %228 = vadd.xlane.f32.xlu0 %v219_v10  ;;  %p663_p5 = scmp.lt.s32.totalorder %s996_s10, %s661_s27  ;;  %p664_p0 = scmp.lt.s32.totalorder %s662_s6, %s656_s30 }
  0x5e   : > { %p659_p4 = pneg %p658_p2 }
  0x5f   : > { %232 = vadd.xlane.f32.xlu1 %v221_v11  ;;  %p665_p6 = por %p664_p0, %p663_p5 }
  0x61   : > { %234 = vadd.xlane.f32.xlu0 %v222_v16  ;;  %p666_p13 = pnand %p665_p6, %p659_p4 }
  0x63   : > { %236 = vadd.xlane.f32.xlu1 %v223_v17 }
  0x65   : > { %238 = vadd.xlane.f32.xlu0 %v224_v22 }
  0x67   : > { %240 = vadd.xlane.f32.xlu1 %v225_v23 }
  0xe6   : > { %v227_v24 = vpop.xlane.xlu0 %226 }
  0xe7   : > { %242 = vxpose.xlu0.b32.start [1/8] (short) (narrow) %v227_v24, 8 }
  0xe8   : > { %v231_v26 = vpop.xlane.xlu1 %230 }
  0xea   : > { %v229_v25 = vpop.xlane.xlu0 %228 }
  0xeb   : > { %243 = vxpose.xlu0.b32.cont [2/8] (short) (narrow) %v229_v25, 8 }
  0xec   : > { %v233_v27 = vpop.xlane.xlu1 %232 }
  0xee   : > { %v235_v28 = vpop.xlane.xlu0 %234 }
  0xef   : > { %244 = vxpose.xlu0.b32.cont [3/8] (short) (narrow) %v231_v26, 8 }
  0xf0   : > { %v237_v29 = vpop.xlane.xlu1 %236 }
  0xf2   : > { %v239_v30 = vpop.xlane.xlu0 %238 }
  0xf3   : > { %245 = vxpose.xlu0.b32.cont [4/8] (short) (narrow) %v233_v27, 8 }
  0xf4   : > { %v241_v31 = vpop.xlane.xlu1 %240 }
  0xf7   : > { %246 = vxpose.xlu0.b32.cont [5/8] (short) (narrow) %v235_v28, 8 }
  0xfb   : > { %247 = vxpose.xlu0.b32.cont [6/8] (short) (narrow) %v237_v29, 8 }
  0xff   : > { %248 = vxpose.xlu0.b32.cont [7/8] (short) (narrow) %v239_v30, 8 }
 0x103   : > { %249 = vxpose.xlu0.b32.end [8/8] (short) (narrow) %v241_v31, 8 }
 0x12c   : > { %593 = vset.pattern.permute.xlu0 %v732_v41 }
 0x167   : > { %v258_v35 = vpop.trf.xlu0 }
 0x168   : > { %v274_v36 = vmul.f32 0.00390625, %v258_v35 }
 0x16a   : > { %v280_v38 = vrot.slane %v274_v36, %v279_v34 }
 0x16c   : > { %v281_v39 = vmul.f32 %v280_v38, %v275_v37 }
 0x16e   : > { %v283_v40 = vsel %vm282_vm0, %v281_v39, 0.0 }
 0x16f   : > { %284 = vadd.xlane.f32.xlu1 %v283_v40 }
 0x1fc   : > { %v285_v43 = vpop.xlane.xlu1 %284 }
 0x1fd   : > { %v286_v44 = vmax.f32 %v285_v43, 0.0 }
 0x1ff   : > { %v287_v45 = vmul.f32 %v286_v44, %v276_v42 }
 0x201   : > { %v288_v46 = vsel %vm282_vm0, %v287_v45, 0.0 }
 0x202   : > { %v289_v47 = vrot.slane %v288_v46, 4 }
 0x204   : > { %v290_v48 = vadd.f32 %v289_v47, %v288_v46 }
 0x206   : > { %v291_v49 = vrot.slane %v290_v48, 2 }
 0x208   : > { %v292_v50 = vadd.f32 %v291_v49, %v290_v48 }
 0x20a   : > { %v293_v51 = vrot.slane %v292_v50, 1 }
 0x20c   : > { %v294_v52 = vadd.f32 %v293_v51, %v292_v50 }
 0x20e   : > { %v521_v53 = vmul.f32 -1.442695, %v294_v52 }
 0x210   : > { %594 = vpow2.f32 %v521_v53 }
 0x21a   : > { %v595_v54 = vpop.eup %594 }
 0x21b   : > { %v298_v55 = vadd.f32 1.0, %v595_v54 }
 0x21d   : > { %596 = vrcp.f32 %v298_v55 }
 0x227   : > { %v597_v56 = vpop.eup %596 }
 0x228   : > { %301 = vxpose.xlu1.b32.start.end [1/1] (short) (narrow) %v597_v56, 64 }
 0x246   : > { %592 = vset.pattern.permute.xlu1 %v732_v41 }
 0x2a8   : > { %v317_v57 = vpop.trf.xlu1 }
 0x2a9   : > { %343 = vperm.xlu1 %592, %v317_v57  }
 0x2ac   : > { %v318_v58 = vpop.trf.xlu1 }
 0x2ad   : > { %348 = vperm.xlu0 %593, %v318_v58  }
 0x2b0   : > { %v319_v59 = vpop.trf.xlu1 }
 0x2b1   : > { %353 = vperm.xlu1 %592, %v319_v59  }
 0x2b4   : > { %v320_v60 = vpop.trf.xlu1 }
 0x2b5   : > { %358 = vperm.xlu0 %593, %v320_v60  }
 0x2b8   : > { %v321_v61 = vpop.trf.xlu1 }
 0x2b9   : > { %363 = vperm.xlu1 %592, %v321_v61  }
 0x2bc   : > { %v322_v62 = vpop.trf.xlu1 }
 0x2bd   : > { %368 = vperm.xlu0 %593, %v322_v62  }
 0x2c0   : > { %v323_v63 = vpop.trf.xlu1 }
 0x2c1   : > { %373 = vperm.xlu1 %592, %v323_v63  }
 0x2c4   : > { %v324_v3 = vpop.trf.xlu1 }
 0x2c5   : > { %378 = vperm.xlu0 %593, %v324_v3  }
 0x328   : > { %v344_v7 = vpop.permute.xlu1 %343 }
 0x329   : > { %v381_v10 = vmul.f32 %v344_v7, %v906_v0  ;;  %v382_v11 = vmul.f32 %v344_v7, %v908_v1 }
 0x32b   : > { %397 = vst [vmem:[%s961_s4] sm:$0xff] %v381_v10  ;;  %398 = vst [vmem:[%s961_s4 + $0x8] sm:$0xff] %v382_v11 }
 0x32c   : > { %v349_v16 = vpop.permute.xlu0 %348 }
 0x32d   : > { %v383_v17 = vmul.f32 %v349_v16, %v910_v2  ;;  %v384_v0 = vmul.f32 %v349_v16, %v914_v4 }
 0x32f   : > { %399 = vst [vmem:[%s961_s4 + $0x10] sm:$0xff] %v383_v17  ;;  %400 = vst [vmem:[%s961_s4 + $0x18] sm:$0xff] %v384_v0 }
 0x330   : > { %v354_v1 = vpop.permute.xlu1 %353 }
 0x331   : > { %v385_v22 = vmul.f32 %v354_v1, %v916_v5  ;;  %v386_v23 = vmul.f32 %v354_v1, %v918_v6 }
 0x333   : > { %401 = vst [vmem:[%s961_s4 + $0x20] sm:$0xff] %v385_v22  ;;  %402 = vst [vmem:[%s961_s4 + $0x28] sm:$0xff] %v386_v23 }
 0x334   : > { %v359_v24 = vpop.permute.xlu0 %358 }
 0x335   : > { %v387_v25 = vmul.f32 %v359_v24, %v922_v8  ;;  %v388_v2 = vmul.f32 %v359_v24, %v924_v9 }
 0x337   : > { %403 = vst [vmem:[%s961_s4 + $0x30] sm:$0xff] %v387_v25  ;;  %404 = vst [vmem:[%s961_s4 + $0x38] sm:$0xff] %v388_v2 }
 0x338   : > { %v364_v4 = vpop.permute.xlu1 %363 }
 0x339   : > { %v389_v5 = vmul.f32 %v364_v4, %v930_v12  ;;  %v390_v6 = vmul.f32 %v364_v4, %v932_v13 }
 0x33b   : > { %405 = vst [vmem:[%s961_s4 + $0x40] sm:$0xff] %v389_v5  ;;  %406 = vst [vmem:[%s961_s4 + $0x48] sm:$0xff] %v390_v6 }
 0x33c   : > { %v369_v26 = vpop.permute.xlu0 %368 }
 0x33d   : > { %v391_v27 = vmul.f32 %v369_v26, %v934_v14  ;;  %v392_v8 = vmul.f32 %v369_v26, %v936_v15 }
 0x33f   : > { %407 = vst [vmem:[%s961_s4 + $0x50] sm:$0xff] %v391_v27  ;;  %408 = vst [vmem:[%s961_s4 + $0x58] sm:$0xff] %v392_v8 }
 0x340   : > { %v374_v9 = vpop.permute.xlu1 %373 }
 0x341   : > { %v393_v28 = vmul.f32 %v374_v9, %v942_v18  ;;  %v394_v12 = vmul.f32 %v374_v9, %v944_v19 }
 0x343   : > { %409 = vst [vmem:[%s961_s4 + $0x60] sm:$0xff] %v393_v28  ;;  %410 = vst [vmem:[%s961_s4 + $0x68] sm:$0xff] %v394_v12 }
 0x344   : > { %v379_v13 = vpop.permute.xlu0 %378 }
 0x345   : > { %v395_v14 = vmul.f32 %v379_v13, %v946_v20  ;;  %v396_v15 = vmul.f32 %v379_v13, %v948_v21 }
 0x347   : > { %411 = vst [vmem:[%s961_s4 + $0x70] sm:$0xff] %v395_v14  ;;  %412 = vst [vmem:[%s961_s4 + $0x78] sm:$0xff] %v396_v15 }
 0x348   : > { %669 = shalt.err (!%p666_p13)
}
 0x349   : > { %s670_s8 = scalar_lea.hbm %s994_s20, 2048  ;;  %s674_s5 = scalar_lea.hbm %s1047_s3, 4096 }
 0x34a   : > { %p671_p7 = scmp.ne.s32.totalorder %s994_s20, %s670_s8  ;;  %p675_p1 = scmp.lt.u32.totalorder %s994_s20, %s1047_s3 }
 0x34b   : > { %p676_p11 = scmp.lt.u32.totalorder %s674_s5, %s670_s8  ;;  %p678_p9 = scmp.lt.u32.totalorder %s670_s8, %s994_s20 }
 0x34c   : > { %p672_p3 = pnand %p671_p7, %p1066_p10 }
 0x34d   : > { %p677_p8 = por %p676_p11, %p675_p1 }
 0x34e   : > { %p673_p12 = pneg %p672_p3 }
 0x34f   : > { %p679_p2 = por %p678_p9, %p677_p8 }
 0x351   : > { %p680_p4 = pnand %p679_p2, %p673_p12 }
 0x353   : > { %683 = shalt.err (!%p680_p4)
}
 0x354   : > { %s734_s26 = smov 256   ;;  %s735_s4 = smov 16  }
 0x355   : > { %535 = dma.vmem_to_hbm [thread:$0]  (%p1066_p10), %s996_s10, 2048, %s994_s20, %s414_s16, %s734_s26, %s734_s26, %s735_s4  }
 0x356 PF: > { %s442_s7 = sand.u32 1, %s714_s12   ;;  %p1067_p5 = scmp.ne.s32.totalorder %s1056_s25, 0 }
 0x357   : > { %p1068_p0 = scmp.ge.s32.totalorder %s726_s15, 2  ;;  %s443_s29 = scalar_lea.sflag [#allocation4], %s442_s7 }
 0x359   : > { %p546_p6 = pnand %p1068_p0, %p1067_p5 }
 0x35b   : > { %709 = dma.done.wait (!%p546_p6), %s443_s29, 2048  }
 0x35c   : > { %711 = vsyncadd (!%p546_p6), %s443_s29, 4294965248  ;;  %p17_p13 = scmp.ge.s32.totalorder %s781_s18, 4   ;;  %s1069_s12 = smov %s718_s13 }
 0x35d   : > { %s1070_s13 = smov %s722_s14  ;;  %s1071_s14 = smov %s793_s21 }
 0x35e   : > { %s1072_s15 = smov %s781_s18  ;;  %19 = sbr.rel (!%p17_p13) target bundleno = 6 (0x6), region = 81 }
 0x365   :  { %448 = vsyncpa [#allocation3], 1 }
 0x366   :  { %450 = vsyncpa [#allocation3 + $0x1], 1 }
 0x367   :  { %451 = vsyncpa [#allocation6], 1 }
 0x368   :  { %452 = vsyncpa [#allocation4], 1 }
 0x369   :  { %454 = vsyncpa [#allocation4 + $0x1], 1 }

</bundles_post_ra>
